<compile_context>
chip_gen: v7x
topology: tpu7x:2x2x1
jax: 0.10.0
libtpu: 0.0.40
codegen_flags: <defaults>
</compile_context>

<pallas_src>
import functools

import jax
import jax.numpy as jnp
from jax.experimental import pallas as pl
from jax.experimental.pallas import tpu as pltpu


# ------------------------------ small helpers ------------------------------ #

def _round_up(x, m):
    return (x + m - 1) // m * m


def _vmem_budget():
    """Returns (tile_budget_bytes, vmem_limit_bytes) for this TPU generation."""
    try:
        cap = int(pltpu.get_tpu_info().vmem_capacity_bytes)
    except Exception:
        cap = 0
    if cap <= 0:
        cap = 64 * 1024 * 1024            # conservative (v7x-sized) fallback
    # 96 MiB scoped on v5e/v6e (128 MiB physical), 48 MiB on v7x (64 MiB physical).
    vmem_limit = min((cap * 3) // 4, 112 * 1024 * 1024)
    budget = (vmem_limit * 17) // 20      # 85% of the scoped limit for explicit tiles
    return budget, vmem_limit


def _resblock_tiles(M, H, isz, budget):
    """Pick (tm, tc) for the ResBlock kernel.

    Arithmetic intensity on the streamed weight is `tm` flops/byte, so maximize tm
    (up to 1024 / the token count) subject to the VMEM budget; prefer tc in
    {1024,512,256} so the MXU N-dim stays full."""
    tm_cap = max(8, min(1024, _round_up(M, 8)))
    cands = [c for c in (1024, 512, 256) if H % c == 0]
    if not cands:
        cands = [128] if H % 128 == 0 else [H]
    best = None
    for tc in cands:
        fixed = 2 * H * tc * isz + 8 * H              # dbl-buf weight tile + layer bias
        # per-tm bytes: xn in (2*isz) + hid out (2*isz) + bf16 snapshot (isz)
        #              + f32 carry (4) per H column, plus lin/act intermediates.
        per_tm = H * (5 * isz + 4) + 8 * tc
        avail = budget - fixed
        if avail <= 0:
            continue
        tm = min((avail // per_tm) // 8 * 8, tm_cap)
        if tm < 8:
            continue
        score = (min(tm, 768), tc)
        if best is None or score > best[0]:
            best = (score, tm, tc)
    if best is None:
        return 8, cands[-1]
    return best[1], best[2]


def _lm_head_tiles(R, H, V, isz, budget):
    """Pick (tm, tv) for the lm-head GEMM: largest vocab tile whose resident weight
    still leaves room for a >=256-row activation tile."""
    tm_cap = max(8, min(1024, _round_up(R, 8)))
    v_cap = _round_up(V, 128)
    fallback = None
    for tv in (2048, 1024, 512, 256, 128):
        if tv > v_cap:
            continue
        fixed = 2 * H * tv * isz                      # double-buffered weight V-tile
        per_tm = 2 * H * isz + 2 * tv * isz + 4 * tv  # x dbl-buf + out dbl-buf + f32 acc
        avail = budget - fixed
        if avail <= 0:
            continue
        tm = min((avail // per_tm) // 8 * 8, tm_cap)
        if tm < 8:
            continue
        if tm >= min(256, tm_cap):
            return tm, tv
        if fallback is None or tm > fallback[0]:
            fallback = (tm, tv)
    if fallback is None:
        fallback = (8, min(128, v_cap))
    return fallback


# --------------------------- hydra ResBlock stack --------------------------- #

def _hydra_resblock_kernel(xn_ref, w_ref, b_ref, hid_ref, h_ref, hbf_ref,
                           *, tc, n_col, n_layers):
    # grid = (Mt, K, L, Ct): one (token-tile, head, layer, weight-column-tile) per step.
    #   xn_ref:  [tm, H]           x + noise tile (fetched once per token tile)
    #   w_ref:   [1, 1, H, tc]     ResBlock weight column tile for (head k, layer l)
    #   b_ref:   [1, 1, n_col, tc] ResBlock bias for (head k, layer l), resident per layer
    #   hid_ref: [1, tm, H]        per-head hidden-state output
    #   h_ref:   [n_col, tm, tc] f32  residual carry (column-major, updated per column)
    #   hbf_ref: [tm, H]  (weight dtype)  layer-input snapshot fed to the MXU
    l = pl.program_id(2)
    c = pl.program_id(3)

    @pl.when(jnp.logical_and(l == 0, c == 0))
    def _():
        # new (token-tile, head): seed carry & matmul-operand snapshot with x + noise
        for ci in range(n_col):
            sl = slice(ci * tc, (ci + 1) * tc)
            h_ref[ci] = xn_ref[:, sl].astype(jnp.float32)
        hbf_ref[...] = xn_ref[...].astype(hbf_ref.dtype)

    @pl.when(jnp.logical_and(l > 0, c == 0))
    def _():
        # new layer: cast the f32 carry to the matmul dtype once (not per column tile)
        for ci in range(n_col):
            sl = slice(ci * tc, (ci + 1) * tc)
            hbf_ref[:, sl] = h_ref[ci].astype(hbf_ref.dtype)

    # lin = h_layer_in @ W[:, cols] + b[cols]   (low-precision operands, f32 accumulation)
    lin = jnp.dot(hbf_ref[...], w_ref[0, 0], preferred_element_type=jnp.float32)
    b_tile = b_ref[0, 0, pl.ds(c, 1), :].astype(jnp.float32)       # (1, tc)
    act = jax.nn.silu(lin + b_tile)
    # distributed residual update of the f32 carry (no end-of-layer store burst)
    h_ref[c] = h_ref[c] + act

    @pl.when(jnp.logical_and(l == n_layers - 1, c == n_col - 1))
    def _():
        for ci in range(n_col):
            sl = slice(ci * tc, (ci + 1) * tc)
            hid_ref[0, :, sl] = h_ref[ci].astype(hid_ref.dtype)


def hydra_resblocks(x_noisy, w_res, b_res, *, budget, vmem_limit):
    """x_noisy: [M, H]; w_res: [K, L, H, H]; b_res: [K, L, 1, H] -> hid [K, M, H]."""
    M, H = x_noisy.shape
    K, L = w_res.shape[0], w_res.shape[1]
    isz = x_noisy.dtype.itemsize
    tm, tc = _resblock_tiles(M, H, isz, budget)
    n_col = H // tc
    Mp = _round_up(M, tm)
    if Mp != M:
        x_noisy = jnp.pad(x_noisy, ((0, Mp - M), (0, 0)))
    n_mt = Mp // tm
    # resident per-layer bias, reshaped so the column tile is a sublane (not lane) slice
    b4 = b_res.astype(jnp.float32).reshape(K, L, n_col, tc)

    cost = pl.CostEstimate(
        flops=2 * K * L * Mp * H * H + 4 * K * L * Mp * H,
        transcendentals=K * L * Mp * H,
        bytes_accessed=int(isz * (K * L * H * H * n_mt + (1 + K) * Mp * H)
                           + 4 * K * L * H * n_mt))

    hid = pl.pallas_call(
        functools.partial(_hydra_resblock_kernel, tc=tc, n_col=n_col, n_layers=L),
        out_shape=jax.ShapeDtypeStruct((K, Mp, H), x_noisy.dtype),
        grid_spec=pltpu.PrefetchScalarGridSpec(
            num_scalar_prefetch=0,
            grid=(n_mt, K, L, n_col),
            in_specs=[
                pl.BlockSpec((tm, H), lambda m, k, l, c: (m, 0)),
                pl.BlockSpec((1, 1, H, tc), lambda m, k, l, c: (k, l, 0, c)),
                pl.BlockSpec((1, 1, n_col, tc), lambda m, k, l, c: (k, l, 0, 0)),
            ],
            out_specs=pl.BlockSpec((1, tm, H), lambda m, k, l, c: (k, m, 0)),
            scratch_shapes=[
                pltpu.VMEM((n_col, tm, tc), jnp.float32),   # f32 residual carry
                pltpu.VMEM((tm, H), w_res.dtype),           # per-layer matmul operand
            ],
        ),
        compiler_params=pltpu.CompilerParams(
            dimension_semantics=("parallel", "parallel", "arbitrary", "arbitrary"),
            vmem_limit_bytes=vmem_limit),
        cost_estimate=cost,
    )(x_noisy, w_res, b4)
    return hid[:, :M, :] if Mp != M else hid


# ------------------------------ lm-head GEMM -------------------------------- #

def _lm_head_kernel(x_ref, w_ref, o_ref):
    o_ref[...] = jnp.dot(x_ref[...], w_ref[...],
                         preferred_element_type=jnp.float32).astype(o_ref.dtype)


def lm_head_matmul(x, w, *, budget, vmem_limit):
    """x: [R, H]; w: [H, V] -> logits [R, V].  Vocab axis outermost so the weight
    V-tile stays resident across all row tiles (weight HBM traffic ~= H*V)."""
    R, H = x.shape
    V = w.shape[-1]
    isz = x.dtype.itemsize
    tm, tv = _lm_head_tiles(R, H, V, isz, budget)
    Rp, Vp = _round_up(R, tm), _round_up(V, tv)
    if Rp != R:
        x = jnp.pad(x, ((0, Rp - R), (0, 0)))
    if Vp != V:
        w = jnp.pad(w, ((0, 0), (0, Vp - V)))
    n_r, n_v = Rp // tm, Vp // tv

    cost = pl.CostEstimate(
        flops=2 * Rp * H * Vp,
        transcendentals=0,
        bytes_accessed=int(isz * (H * Vp + Rp * H * n_v + Rp * Vp)))

    out = pl.pallas_call(
        _lm_head_kernel,
        out_shape=jax.ShapeDtypeStruct((Rp, Vp), x.dtype),
        grid_spec=pltpu.PrefetchScalarGridSpec(
            num_scalar_prefetch=0,
            grid=(n_v, n_r),
            in_specs=[
                pl.BlockSpec((tm, H), lambda v, r: (r, 0)),
                pl.BlockSpec((H, tv), lambda v, r: (0, v)),
            ],
            out_specs=pl.BlockSpec((tm, tv), lambda v, r: (r, v)),
        ),
        compiler_params=pltpu.CompilerParams(
            dimension_semantics=("parallel", "parallel"),
            vmem_limit_bytes=vmem_limit),
        cost_estimate=cost,
    )(x, w)
    if Rp != R or Vp != V:
        out = out[:R, :V]
    return out


# ------------------------------ model wrapper -------------------------------- #

def init_hydra_params(key, hidden_size, vocab_size, num_heads, num_layers,
                      dtype=jnp.bfloat16):
    k1, k2, k3 = jax.random.split(key, 3)
    scale_h = 1.0 / jnp.sqrt(jnp.float32(hidden_size))
    # base lm head weight (nn.Linear(hidden, vocab, bias=False)), stored [H, V]
    w_orig = (jax.random.normal(k1, (hidden_size, vocab_size), jnp.float32)
              * scale_h).astype(dtype)
    # hydra lm head is initialized from the base lm head weight (lm_head_init_weight)
    w_hydra = w_orig
    # per-head ResBlock linears (hidden -> hidden, with bias)
    w_res = (jax.random.normal(
        k2, (num_heads, num_layers, hidden_size, hidden_size), jnp.float32)
        * scale_h).astype(dtype)
    b_res = (jax.random.uniform(
        k3, (num_heads, num_layers, 1, hidden_size), jnp.float32, -1.0, 1.0) * scale_h)
    return {"w_orig_lm_head": w_orig, "w_hydra_lm_head": w_hydra,
            "w_res": w_res, "b_res": b_res}


def make_hydra_noise(base_hidden_states, input_ids, *, noise_alpha,
                     pad_token_id, key):
    # noise = (rand*2 - 1) * noise_alpha / sqrt(seq_len * model_dim)
    B, S, H = base_hidden_states.shape
    seq_len = jnp.maximum(jnp.sum(input_ids != pad_token_id, axis=-1), 1)    # [B]
    denom = jnp.sqrt((seq_len * H).astype(jnp.float32))[:, None, None]       # [B,1,1]
    noise = jax.random.uniform(key, (B, S, H), jnp.float32) * 2.0 - 1.0
    return (noise * noise_alpha / denom).astype(base_hidden_states.dtype)


def hydra_model_forward(base_hidden_states, input_ids, params, *,
                        noise_alpha=0.0, pad_token_id=0, noise_key=None):
    """Mirrors HydraModel.forward(base_hidden_states=..., output_orig=True,
    run_hydra_head=True) for the 'mlp' head architecture (grounded_heads=False)."""
    B, S, H = base_hidden_states.shape
    w_orig, w_hydra = params["w_orig_lm_head"], params["w_hydra_lm_head"]
    w_res, b_res = params["w_res"], params["b_res"]
    K = w_res.shape[0]
    V = w_orig.shape[-1]
    budget, vmem_limit = _vmem_budget()

    if noise_key is None:
        noise_key = jax.random.PRNGKey(0)
    noise = make_hydra_noise(base_hidden_states, input_ids,
                             noise_alpha=noise_alpha,
                             pad_token_id=pad_token_id, key=noise_key)

    x_base = base_hidden_states.reshape(B * S, H)
    x_noisy = (base_hidden_states + noise).reshape(B * S, H)   # model dtype, as in torch

    # hydra MLP heads: ResBlock stacks with layer/column-streamed weights.
    hid = hydra_resblocks(x_noisy, w_res, b_res,
                          budget=budget, vmem_limit=vmem_limit)       # [K, M, H]

    # orig lm head on the clean base hidden states.
    orig_logits = lm_head_matmul(x_base, w_orig,
                                 budget=budget, vmem_limit=vmem_limit)
    # shared hydra lm head on every head's hidden states (head axis flattened into rows
    # so small-M decode shapes still feed full-height MXU tiles).
    hyd_logits = lm_head_matmul(hid.reshape(K * B * S, H), w_hydra,
                                budget=budget, vmem_limit=vmem_limit)

    hydra_hidden_states = hid.reshape(K, B, S, H)      # torch.stack(hidden, dim=0)
    hydra_logits = hyd_logits.reshape(K, B, S, V)      # torch.stack(logits, dim=0)
    orig_logits = orig_logits.reshape(B, S, V)
    outputs = None   # base model not run on the base_hidden_states path
    return hydra_logits, hydra_hidden_states, outputs, orig_logits, base_hidden_states


# ----------------------------- pure-JAX reference ---------------------------- #

def _reference_forward(base_hidden_states, noise, params):
    """Pure-JAX mirror of the kernel numerics (low-precision operands, f32 accumulate)."""
    B, S, H = base_hidden_states.shape
    w_orig, w_hydra = params["w_orig_lm_head"], params["w_hydra_lm_head"]
    w_res, b_res = params["w_res"], params["b_res"]
    K, L = w_res.shape[0], w_res.shape[1]
    V = w_orig.shape[-1]
    dt = base_hidden_states.dtype
    x = base_hidden_states.reshape(B * S, H)
    xn = x + noise.reshape(B * S, H)                    # model dtype, matches torch
    hids, hlogs = [], []
    for k in range(K):
        h = xn.astype(jnp.float32)
        for l in range(L):
            lin = jnp.dot(h.astype(w_res.dtype), w_res[k, l],
                          preferred_element_type=jnp.float32) + b_res[k, l]
            h = h + jax.nn.silu(lin)
        hk = h.astype(dt)
        hids.append(hk)
        hlogs.append(jnp.dot(hk, w_hydra,
                             preferred_element_type=jnp.float32).astype(dt))
    orig = jnp.dot(x, w_orig, preferred_element_type=jnp.float32).astype(dt)
    return (jnp.stack(hlogs).reshape(K, B, S, V),
            jnp.stack(hids).reshape(K, B, S, H),
            orig.reshape(B, S, V))


# --------------------------------- main ------------------------------------- #

if __name__ == "__main__":
    B, S = 2, 8
    hidden_size = 128
    vocab_size = 256
    hydra_num_heads = 4
    hydra_num_layers = 2
    pad_token_id = 0
    noise_alpha = 0.5

    root = jax.random.PRNGKey(0)
    k_param, k_hidden, k_ids, k_noise = jax.random.split(root, 4)

    params = init_hydra_params(k_param, hidden_size, vocab_size,
                               hydra_num_heads, hydra_num_layers,
                               dtype=jnp.bfloat16)
    base_hidden_states = jax.random.normal(
        k_hidden, (B, S, hidden_size), jnp.float32).astype(jnp.bfloat16)
    input_ids = jax.random.randint(k_ids, (B, S), 1, vocab_size, dtype=jnp.int32)
    input_ids = input_ids.at[0, -2:].set(pad_token_id)     # some padding tokens

    (hydra_logits, hydra_hidden, outputs, orig_logits, bhs) = hydra_model_forward(
        base_hidden_states, input_ids, params,
        noise_alpha=noise_alpha, pad_token_id=pad_token_id, noise_key=k_noise)
    jax.block_until_ready((hydra_logits, hydra_hidden, orig_logits))

    # shape / sanity checks
    assert hydra_logits.shape == (hydra_num_heads, B, S, vocab_size)
    assert hydra_hidden.shape == (hydra_num_heads, B, S, hidden_size)
    assert orig_logits.shape == (B, S, vocab_size)
    assert outputs is None
    assert bool(jnp.all(jnp.isfinite(hydra_logits.astype(jnp.float32))))

    # numerical check against a pure-JAX reference with matching numerics
    noise = make_hydra_noise(base_hidden_states, input_ids,
                             noise_alpha=noise_alpha,
                             pad_token_id=pad_token_id, key=k_noise)
    ref_logits, ref_hidden, ref_orig = _reference_forward(
        base_hidden_states, noise, params)
    for got, ref in ((hydra_logits, ref_logits),
                     (hydra_hidden, ref_hidden),
                     (orig_logits, ref_orig)):
        g32, r32 = got.astype(jnp.float32), ref.astype(jnp.float32)
        assert jnp.allclose(g32, r32, atol=5e-2, rtol=5e-2), \
            float(jnp.max(jnp.abs(g32 - r32)))

    print("KERNEL_OK")
</pallas_src>

<mosaic_0001>
module attributes {stable_mosaic.version = 11 : i64} {
  func.func @_hydra_resblock_kernel(%arg0: i32, %arg1: i32, %arg2: i32, %arg3: i32, %arg4: memref<16x128xbf16, #tpu.memory_space<vmem>>, %arg5: memref<1x1x128x128xbf16, #tpu.memory_space<vmem>>, %arg6: memref<1x1x1x128xf32, #tpu.memory_space<vmem>>, %arg7: memref<1x16x128xbf16, #tpu.memory_space<vmem>>, %arg8: memref<1x16x128xf32, #tpu.memory_space<vmem>>, %arg9: memref<16x128xbf16, #tpu.memory_space<vmem>>) attributes {dimension_semantics = [#tpu.dimension_semantics<parallel>, #tpu.dimension_semantics<parallel>, #tpu.dimension_semantics<arbitrary>, #tpu.dimension_semantics<arbitrary>], iteration_bounds = array<i64: 1, 4, 2, 1>, scalar_prefetch = 0 : i64, scratch_operands = 2 : i64, tpu.core_type = #tpu.core_type<tc>, window_params = [{transform_indices = @transform_0, window_bounds = array<i64: 16, 128>}, {transform_indices = @transform_1, window_bounds = array<i64: 1, 1, 128, 128>}, {transform_indices = @transform_2, window_bounds = array<i64: 1, 1, 1, 128>}, {transform_indices = @transform_3, window_bounds = array<i64: 1, 16, 128>}]} {
    %c0_i32 = arith.constant 0 : i32
    %0 = arith.cmpi eq, %arg2, %c0_i32 : i32
    %c0_i32_0 = arith.constant 0 : i32
    %1 = arith.cmpi eq, %arg3, %c0_i32_0 : i32
    %2 = arith.andi %0, %1 : i1
    %3 = arith.extui %2 : i1 to i32
    %c0_i32_1 = arith.constant 0 : i32
    %4 = arith.cmpi ne, %3, %c0_i32_1 : i32
    scf.if %4 {
      %c0_20 = arith.constant 0 : index
      %c0_21 = arith.constant 0 : index
      %38 = vector.load %arg4[%c0_20, %c0_21] : memref<16x128xbf16, #tpu.memory_space<vmem>>, vector<16x128xbf16>
      %39 = arith.extf %38 : vector<16x128xbf16> to vector<16x128xf32>
      %c0_22 = arith.constant 0 : index
      %c0_23 = arith.constant 0 : index
      %c0_24 = arith.constant 0 : index
      %40 = vector.load %arg8[%c0_22, %c0_23, %c0_24] : memref<1x16x128xf32, #tpu.memory_space<vmem>>, vector<1x16x128xf32>
      %41 = vector.shape_cast %40 : vector<1x16x128xf32> to vector<16x128xf32>
      %42 = vector.shape_cast %39 : vector<16x128xf32> to vector<1x16x128xf32>
      tpu.vector_store %arg8[%c0_22, %c0_23, %c0_24], %42 {strides = array<i32>} : memref<1x16x128xf32, #tpu.memory_space<vmem>>, vector<1x16x128xf32>,
      %c0_25 = arith.constant 0 : index
      %c0_26 = arith.constant 0 : index
      %43 = vector.load %arg4[%c0_25, %c0_26] : memref<16x128xbf16, #tpu.memory_space<vmem>>, vector<16x128xbf16>
      %c0_27 = arith.constant 0 : index
      %c0_28 = arith.constant 0 : index
      %44 = vector.load %arg9[%c0_27, %c0_28] : memref<16x128xbf16, #tpu.memory_space<vmem>>, vector<16x128xbf16>
      tpu.vector_store %arg9[%c0_27, %c0_28], %43 {strides = array<i32>} : memref<16x128xbf16, #tpu.memory_space<vmem>>, vector<16x128xbf16>,
    } else {
    }
    %c0_i32_2 = arith.constant 0 : i32
    %5 = arith.cmpi sgt, %arg2, %c0_i32_2 : i32
    %c0_i32_3 = arith.constant 0 : i32
    %6 = arith.cmpi eq, %arg3, %c0_i32_3 : i32
    %7 = arith.andi %5, %6 : i1
    %8 = arith.extui %7 : i1 to i32
    %c0_i32_4 = arith.constant 0 : i32
    %9 = arith.cmpi ne, %8, %c0_i32_4 : i32
    scf.if %9 {
      %c0_20 = arith.constant 0 : index
      %c0_21 = arith.constant 0 : index
      %c0_22 = arith.constant 0 : index
      %38 = vector.load %arg8[%c0_20, %c0_21, %c0_22] : memref<1x16x128xf32, #tpu.memory_space<vmem>>, vector<1x16x128xf32>
      %39 = vector.shape_cast %38 : vector<1x16x128xf32> to vector<16x128xf32>
      %40 = arith.truncf %39 : vector<16x128xf32> to vector<16x128xbf16>
      %c0_23 = arith.constant 0 : index
      %c0_24 = arith.constant 0 : index
      %41 = vector.load %arg9[%c0_23, %c0_24] : memref<16x128xbf16, #tpu.memory_space<vmem>>, vector<16x128xbf16>
      tpu.vector_store %arg9[%c0_23, %c0_24], %40 {strides = array<i32>} : memref<16x128xbf16, #tpu.memory_space<vmem>>, vector<16x128xbf16>,
    } else {
    }
    %c0 = arith.constant 0 : index
    %c0_5 = arith.constant 0 : index
    %10 = vector.load %arg9[%c0, %c0_5] : memref<16x128xbf16, #tpu.memory_space<vmem>>, vector<16x128xbf16>
    %c0_6 = arith.constant 0 : index
    %c0_7 = arith.constant 0 : index
    %c0_8 = arith.constant 0 : index
    %c0_9 = arith.constant 0 : index
    %11 = vector.load %arg5[%c0_6, %c0_7, %c0_8, %c0_9] : memref<1x1x128x128xbf16, #tpu.memory_space<vmem>>, vector<1x1x128x128xbf16>
    %12 = vector.shape_cast %11 : vector<1x1x128x128xbf16> to vector<128x128xbf16>
    %cst = arith.constant dense<0.000000e+00> : vector<16x128xf32>
    %13 = tpu.matmul %10, %12, %cst {dimension_numbers = #tpu.dot_dimension_numbers<[1], [0], [0], [1], [0, 0, 1, 1], [], []>} : vector<16x128xbf16>, vector<128x128xbf16>, vector<16x128xf32> -> vector<16x128xf32>
    %c0_10 = arith.constant 0 : index
    %c0_11 = arith.constant 0 : index
    %14 = arith.index_cast %arg3 : i32 to index
    %c0_12 = arith.constant 0 : index
    %15 = vector.load %arg6[%c0_10, %c0_11, %14, %c0_12] : memref<1x1x1x128xf32, #tpu.memory_space<vmem>>, vector<1x1x1x128xf32>
    %16 = vector.shape_cast %15 : vector<1x1x1x128xf32> to vector<1x128xf32>
    %17 = vector.broadcast %16 : vector<1x128xf32> to vector<16x128xf32>
    %18 = arith.addf %13, %17 : vector<16x128xf32>
    %19 = arith.negf %18 : vector<16x128xf32>
    %20 = math.exp %19 : vector<16x128xf32>
    %cst_13 = arith.constant 1.000000e+00 : f32
    %21 = vector.broadcast %cst_13 : f32 to vector<16x128xf32>
    %22 = arith.addf %21, %20 : vector<16x128xf32>
    %23 = arith.divf %21, %22 : vector<16x128xf32>
    %24 = arith.mulf %18, %23 : vector<16x128xf32>
    %25 = arith.index_cast %arg3 : i32 to index
    %c0_14 = arith.constant 0 : index
    %c0_15 = arith.constant 0 : index
    %26 = vector.load %arg8[%25, %c0_14, %c0_15] : memref<1x16x128xf32, #tpu.memory_space<vmem>>, vector<1x16x128xf32>
    %27 = vector.shape_cast %26 : vector<1x16x128xf32> to vector<16x128xf32>
    %28 = arith.addf %27, %24 : vector<16x128xf32>
    %29 = arith.index_cast %arg3 : i32 to index
    %c0_16 = arith.constant 0 : index
    %c0_17 = arith.constant 0 : index
    %30 = vector.load %arg8[%29, %c0_16, %c0_17] : memref<1x16x128xf32, #tpu.memory_space<vmem>>, vector<1x16x128xf32>
    %31 = vector.shape_cast %30 : vector<1x16x128xf32> to vector<16x128xf32>
    %32 = vector.shape_cast %28 : vector<16x128xf32> to vector<1x16x128xf32>
    tpu.vector_store %arg8[%29, %c0_16, %c0_17], %32 {strides = array<i32>} : memref<1x16x128xf32, #tpu.memory_space<vmem>>, vector<1x16x128xf32>,
    %c1_i32 = arith.constant 1 : i32
    %33 = arith.cmpi eq, %arg2, %c1_i32 : i32
    %c0_i32_18 = arith.constant 0 : i32
    %34 = arith.cmpi eq, %arg3, %c0_i32_18 : i32
    %35 = arith.andi %33, %34 : i1
    %36 = arith.extui %35 : i1 to i32
    %c0_i32_19 = arith.constant 0 : i32
    %37 = arith.cmpi ne, %36, %c0_i32_19 : i32
    scf.if %37 {
      %c0_20 = arith.constant 0 : index
      %c0_21 = arith.constant 0 : index
      %c0_22 = arith.constant 0 : index
      %38 = vector.load %arg8[%c0_20, %c0_21, %c0_22] : memref<1x16x128xf32, #tpu.memory_space<vmem>>, vector<1x16x128xf32>
      %39 = vector.shape_cast %38 : vector<1x16x128xf32> to vector<16x128xf32>
      %40 = arith.truncf %39 : vector<16x128xf32> to vector<16x128xbf16>
      %c0_23 = arith.constant 0 : index
      %c0_24 = arith.constant 0 : index
      %c0_25 = arith.constant 0 : index
      %41 = vector.load %arg7[%c0_23, %c0_24, %c0_25] : memref<1x16x128xbf16, #tpu.memory_space<vmem>>, vector<1x16x128xbf16>
      %42 = vector.shape_cast %41 : vector<1x16x128xbf16> to vector<16x128xbf16>
      %43 = vector.shape_cast %40 : vector<16x128xbf16> to vector<1x16x128xbf16>
      tpu.vector_store %arg7[%c0_23, %c0_24, %c0_25], %43 {strides = array<i32>} : memref<1x16x128xbf16, #tpu.memory_space<vmem>>, vector<1x16x128xbf16>,
    } else {
    }
    return
  }
  func.func @transform_0(%arg0: i32, %arg1: i32, %arg2: i32, %arg3: i32) -> (i32, i32) {
    %c0_i32 = arith.constant 0 : i32
    %c0_i32_0 = arith.constant 0 : i32
    return %arg0, %c0_i32 : i32, i32
  }
  func.func @transform_1(%arg0: i32, %arg1: i32, %arg2: i32, %arg3: i32) -> (i32, i32, i32, i32) {
    %c0_i32 = arith.constant 0 : i32
    %c0_i32_0 = arith.constant 0 : i32
    return %arg1, %arg2, %c0_i32, %arg3 : i32, i32, i32, i32
  }
  func.func @transform_2(%arg0: i32, %arg1: i32, %arg2: i32, %arg3: i32) -> (i32, i32, i32, i32) {
    %c0_i32 = arith.constant 0 : i32
    %c0_i32_0 = arith.constant 0 : i32
    %c0_i32_1 = arith.constant 0 : i32
    return %arg1, %arg2, %c0_i32, %c0_i32_0 : i32, i32, i32, i32
  }
  func.func @transform_3(%arg0: i32, %arg1: i32, %arg2: i32, %arg3: i32) -> (i32, i32, i32) {
    %c0_i32 = arith.constant 0 : i32
    %c0_i32_0 = arith.constant 0 : i32
    return %arg1, %arg0, %c0_i32 : i32, i32, i32
  }
}

</mosaic_0001>

<bundles_post_ra>
// kernel: tpu_custom_call.1
= control target key start
LH: loop header
LB: loop body
LE: loop exit
PB: predicated region body
PF: predicated region fallthrough
CT: control target
= control target key end

     0   :  { %s1437_s0 = inlined_call_operand.hbm [shape: bf16[16,128], index: 0, kind: input, shape index: {}]   ;;  %s1438_s1 = inlined_call_operand.hbm [shape: bf16[4,2,128,128], index: 1, kind: input, shape index: {}]   ;;  %s1439_s2 = inlined_call_operand.hbm [shape: f32[4,2,1,128], index: 2, kind: input, shape index: {}]   ;;  %s1440_s3 = inlined_call_operand.hbm [shape: bf16[4,16,128], index: 3, kind: output, shape index: {}]  }
   0x1   :  { %1455 = sst [smem:[#allocation20_spill]] %s1438_s1 }
   0x2   :  { %1456 = sst [smem:[#allocation21_spill]] %s1440_s3 }
   0x3   :  { %8 = vsyncpa [#allocation5], 0 }
   0x4   :  { %9 = vsyncpa [#allocation8], 0 }
   0x5   :  { %11 = vsyncpa [#allocation8 + $0x1], 0 }
   0x6   :  { %12 = vsyncpa [#allocation6], 0 }
   0x7   :  { %14 = vsyncpa [#allocation6 + $0x1], 0  ;;  %s1085_s12 = smov 0   ;;  %s1087_s13 = smov 0  }
   0x8   :  { %s1089_s14 = smov 0   ;;  %s1091_s15 = smov 0  }
   0x9   :  { %s1093_s16 = smov 0   ;;  %s1095_s17 = smov 0  }
   0xa   :  { %s1097_s18 = smov 0   ;;  %s1099_s19 = smov 0  }
   0xb   :  { %s1101_s20 = smov 0   ;;  %s1103_s21 = smov 0  }
   0xc   :  { %s1105_s22 = smov 0  }
   0xd LB: > { %1457 = sst [smem:[#allocation14_spill]] %s1033_s17  ;;  %s38_s23 = sadd.s32 1, %s1045_s20  ;;  %s1053_s22 = sphi %s1105_s22, %s20_s22   ;;  %s1049_s21 = sphi %s1103_s21, %s1488_s21   ;;  %s1045_s20 = sphi %s1101_s20, %s1495_s20   ;;  %s1041_s19 = sphi %s1099_s19, %s1486_s19   ;;  %s1037_s18 = sphi %s1097_s18, %s1494_s18   ;;  %s1033_s17 = sphi %s1095_s17, %s1485_s17   ;;  %s1029_s16 = sphi %s1093_s16, %s1493_s16   ;;  %s1025_s15 = sphi %s1091_s15, %s1492_s15   ;;  %s1021_s14 = sphi %s1089_s14, %s1491_s14   ;;  %s1017_s13 = sphi %s1087_s13, %s1490_s13   ;;  %s1013_s12 = sphi %s1085_s12, %s1489_s12  }
   0xe   : > { %1458 = sst [smem:[#allocation15_spill]] %s1041_s19  ;;  %s42_s24 = sadd.s32 1, %s1049_s21 }
   0xf   : > { %1459 = sst [smem:[#allocation16_spill]] %s1049_s21  ;;  %p40_p0 = scmp.ge.s32.totalorder %s38_s23, 2 }
  0x10   : > { %s83_s25 = sadd.s32 1, %s1033_s17  ;;  %p90_p1 = scmp.ne.s32.totalorder %s1033_s17, %s1029_s16 }
  0x11   : > { %p91_p2 = scmp.eq.s32.totalorder %s1053_s22, 0  ;;  %s1497_s23 = smov (%p40_p0, %s38_s23), 0 }
  0x12   : > { %1460 = sst [smem:[#allocation17_spill]] %s1497_s23  ;;  %s1499_s24 = smov (!%p40_p0, %s42_s24), %s1049_s21 }
  0x13   : > { %s77_s26 = ssub.s32 %s1045_s20, %s1497_s23  ;;  %p1151_p3 = por %p91_p2, %p90_p1 }
  0x14   : > { %p44_p4 = scmp.ge.s32.totalorder %s1499_s24, 4  ;;  %p724_p5 = scmp.lt.s32.totalorder %s1053_s22, 8 }
  0x15   : > { %s192_s28 = sand.u32 1, %s1053_s22   ;;  %s194_s4 = sand.u32 1, %s1033_s17  }
  0x16   : > { %s1501_s24 = smov (%p44_p4, %s1499_s24), 0  ;;  %s622_s5 = sshll.u32 %s194_s4, 6 }
  0x17   : > { %1462 = sst [smem:[#allocation18_spill]] %s1501_s24  ;;  %s1161_s29 = ssub.s32 %s1049_s21, %s1501_s24 }
  0x18   : > { %s78_s30 = sor.u32 %s77_s26, %s1161_s29  ;;  %p137_p6 = scmp.eq.s32.totalorder %s1161_s29, 0 }
  0x19   : > { %p81_p7 = scmp.eq.s32.totalorder %s78_s30, 0  ;;  %s623_s6 = sshll.u32 %s1045_s20, 4 }
  0x1a   : > { %s624_s8 = sshll.u32 %s1049_s21, 5  ;;  %s196_s10 = scalar_lea.vmem [#allocation7], %s622_s5 }
  0x1b   : > { %s1170_s7 = scalar_select %p81_p7, %s1033_s17, %s83_s25  }
  0x1c   : > { %s203_s9 = sadd.s32 %s624_s8, %s623_s6  ;;  %s206_s11 = sshll.u32 %s196_s10, 4  ;;  %s1173_s11 = int_to_ptr.vmem [resolvable:$true] %s206_s11 }
  0x1d   : > { %1463 = sst [smem:[#allocation19_spill]] %s1170_s7  ;;  %s625_s23 = sshll.u32 %s203_s9, 6 }
  0x1e   : > { %s1464_s1 = sld [smem:[#allocation20_spill]]  ;;  %p1184_p8 = pnand %p724_p5, %p1151_p3 }
  0x1f   : > { %s1188_s26 = scalar_lea.sflag [#allocation8], %s192_s28 }
  0x20   : > { %s1465_s25 = scalar_select %p1184_p8, 1, 0 }
  0x21   : > { %p1449_p10 = pneg %p1184_p8 }
  0x24   : > { %s1178_s19 = scalar_lea.hbm %s1464_s1, %s625_s23  ;;  %s844_s24 = scalar_lea.hbm %s1464_s1, 8192 }
  0x25   : > { %s839_s30 = scalar_lea.hbm %s1178_s19, 1024  ;;  %p845_p13 = scmp.lt.u32.totalorder %s1178_s19, %s1464_s1 }
  0x26   : > { %p840_p9 = scmp.ne.s32.totalorder %s1178_s19, %s839_s30  ;;  %p846_p0 = scmp.lt.u32.totalorder %s844_s24, %s839_s30 }
  0x27   : > { %p848_p2 = scmp.lt.u32.totalorder %s839_s30, %s1178_s19 }
  0x28   : > { %p842_p11 = pnand %p1449_p10, %p840_p9  ;;  %p847_p1 = por %p846_p0, %p845_p13 }
  0x2a   : > { %p843_p12 = pneg %p842_p11  ;;  %p849_p3 = por %p848_p2, %p847_p1 }
  0x2c   : > { %p850_p4 = pnand %p849_p3, %p843_p12 }
  0x2e   : > { %853 = shalt.err (!%p850_p4)
}
  0x2f   : > { %s854_s28 = scalar_lea.vmem %s1173_s11, 1024  ;;  %s1055_s6 = smov [#allocation7]  }
  0x30   : > { %p855_p5 = scmp.ne.s32.totalorder %s1173_s11, %s854_s28  ;;  %s859_s8 = sshll.u32 %s1055_s6, 4  ;;  %s860_s8 = int_to_ptr.vmem [resolvable:$false] %s859_s8 }
  0x31   : > { %s861_s9 = scalar_lea.vmem %s860_s8, 2048  ;;  %p862_p11 = scmp.lt.s32.totalorder %s1173_s11, %s860_s8 }
  0x32   : > { %p857_p7 = pnand %p855_p5, %p1449_p10  ;;  %p863_p13 = scmp.lt.s32.totalorder %s861_s9, %s854_s28 }
  0x34   : > { %p858_p9 = pneg %p857_p7  ;;  %p864_p0 = por %p863_p13, %p862_p11 }
  0x36   : > { %p865_p1 = pnand %p864_p0, %p858_p9 }
  0x38   : > { %868 = shalt.err (!%p865_p1)
}
  0x39   : > { %s1444_s10 = smov 64   ;;  %s1445_s30 = smov 4  }
  0x3a   : > { %715 = dma.hbm_to_vmem [thread:$0]  (!%p1184_p8), %s1178_s19, 1024, %s1173_s11, %s1188_s26, %s1444_s10, %s1444_s10, %s1445_s30  }
  0x3b   : > { %s1220_s3 = sadd.s32 4294967295, %s1053_s22   ;;  %s618_s23 = sadd.s32 4294967294, %s1053_s22  }
  0x3c   : > { %p96_p12 = scmp.ne.s32.totalorder %s1029_s16, %s1025_s15  ;;  %p1448_p2 = scmp.eq.s32.totalorder %s1220_s3, 0 }
  0x3d   : > { %s139_s24 = sadd.s32 1, %s1021_s14  ;;  %p149_p4 = scmp.ne.s32.totalorder %s1021_s14, %s1017_s13 }
  0x3e   : > { %s1230_s27 = scalar_select %p137_p6, %s1021_s14, %s139_s24  }
  0x3f   : > { %p1234_p3 = por %p1448_p2, %p96_p12  ;;  %p150_p5 = scmp.eq.s32.totalorder %s1220_s3, 7 }
  0x40   : > { %p155_p7 = scmp.ne.s32.totalorder %s1017_s13, %s1013_s12  ;;  %p156_p9 = scmp.eq.s32.totalorder %s618_s23, 7 }
  0x41   : > { %s1466_s5 = scalar_select %p1234_p3, 1, 0 }
  0x42   : > { %p619_p11 = scmp.ge.s32.totalorder %s1053_s22, 1  ;;  %p1244_p13 = por %p150_p5, %p149_p4 }
  0x43   : > { %p163_p0 = scmp.lt.s32.totalorder %s1053_s22, 9  ;;  %p1249_p6 = por %p156_p9, %p155_p7 }
  0x44   : > { %s1467_s15 = scalar_select %p1244_p13, 1, 0 }
  0x45   : > { %s1468_s19 = scalar_select %p1249_p6, 1, 0 }
  0x46   : > { %p1253_p1 = pnand %p619_p11, %p163_p0  ;;  %s1058_s11 = smov [#allocation4]  }
  0x47   : > { %s178_s28 = sshll.u32 %s1058_s11, 4  ;;  %s626_s6 = sshll.u32 %s1049_s21, 1  ;;  %s1259_s28 = int_to_ptr.vmem [resolvable:$true] %s178_s28 }
  0x48   : > { %s1469_s29 = scalar_select %p1253_p1, 1, 0 }
  0x49   : > { %p708_p12 = pneg %p1253_p1  ;;  %s219_s8 = scalar_lea.vmem [#allocation9], %s194_s4 }
  0x4a   : > { %s228_s9 = sshll.u32 %s219_s8, 4  ;;  %s224_s24 = sadd.s32 %s1045_s20, %s626_s6  ;;  %s1271_s9 = int_to_ptr.vmem [resolvable:$true] %s228_s9 }
  0x4b   : > { %p1266_p4 = pnand %p708_p12, %p1448_p2  ;;  %s627_s10 = sshll.u32 %s224_s24, 4 }
  0x4c   : > { %s1276_s1 = scalar_lea.hbm %s1439_s2, %s627_s10  ;;  %s869_s4 = scalar_lea.hbm %s1437_s0, 128 }
  0x4d   : > { %p870_p5 = scmp.ne.s32.totalorder %s1437_s0, %s869_s4  ;;  %p871_p7 = pneg %p1266_p4 }
  0x4e   : > { %p876_p0 = scmp.lt.u32.totalorder %s869_s4, %s1437_s0 }
  0x4f   : > { %p872_p9 = pnand %p871_p7, %p870_p5 }
  0x51   : > { %p873_p11 = pneg %p872_p9 }
  0x53   : > { %p878_p12 = pnand %p876_p0, %p873_p11 }
  0x55   : > { %881 = shalt.err (!%p878_p12)
}
  0x56   : > { %s882_s10 = scalar_lea.vmem %s1259_s28, 128  ;;  %p890_p13 = scmp.lt.s32.totalorder %s1259_s28, %s1259_s28 }
  0x57   : > { %p883_p2 = scmp.ne.s32.totalorder %s1259_s28, %s882_s10  ;;  %p891_p3 = scmp.lt.s32.totalorder %s882_s10, %s882_s10 }
  0x59   : > { %p885_p10 = pnand %p883_p2, %p871_p7  ;;  %p892_p1 = por %p891_p3, %p890_p13 }
  0x5b   : > { %p886_p6 = pneg %p885_p10 }
  0x5d   : > { %p893_p8 = pnand %p892_p1, %p886_p6 }
  0x5f   : > { %896 = shalt.err (!%p893_p8)
}
  0x60   : > { %s1471_s17 = smov 4   ;;  %s1472_s21 = smov 64  }
  0x61   : > { %711 = dma.hbm_to_vmem [thread:$0]  (!%p1266_p4), %s1437_s0, 128, %s1259_s28, [#allocation5], %s1472_s21, %s1472_s21, %s1471_s17  }
  0x62   : > { %s897_s11 = scalar_lea.hbm %s1276_s1, 16  ;;  %p1473_p2 = scmp.ne.s32.totalorder %s1465_s25, 0 }
  0x63   : > { %p898_p10 = scmp.ne.s32.totalorder %s1276_s1, %s897_s11  ;;  %s902_s8 = scalar_lea.hbm %s1439_s2, 128 }
  0x64   : > { %p1474_p3 = pneg %p1473_p2  ;;  %p903_p6 = scmp.lt.u32.totalorder %s1276_s1, %s1439_s2 }
  0x65   : > { %p904_p1 = scmp.lt.u32.totalorder %s902_s8, %s897_s11  ;;  %p906_p7 = scmp.lt.u32.totalorder %s897_s11, %s1276_s1 }
  0x66   : > { %p900_p8 = pnand %p898_p10, %p1474_p3 }
  0x67   : > { %p905_p5 = por %p904_p1, %p903_p6 }
  0x68   : > { %p901_p13 = pneg %p900_p8 }
  0x69   : > { %p907_p9 = por %p906_p7, %p905_p5 }
  0x6b   : > { %p908_p11 = pnand %p907_p9, %p901_p13 }
  0x6d   : > { %911 = shalt.err (!%p908_p11)
}
  0x6e   : > { %s912_s28 = scalar_lea.vmem %s1271_s9, 16  ;;  %p1475_p0 = pmov %p1474_p3 }
  0x6f   : > { %p913_p4 = scmp.ne.s32.totalorder %s1271_s9, %s912_s28  ;;  %s1059_s10 = smov [#allocation9]  }
  0x70   : > { %s917_s17 = sshll.u32 %s1059_s10, 4  ;;  %s918_s17 = int_to_ptr.vmem [resolvable:$false] %s917_s17 }
  0x71   : > { %p915_p12 = pnand %p913_p4, %p1475_p0  ;;  %s919_s21 = scalar_lea.vmem %s918_s17, 32 }
  0x72   : > { %p920_p3 = scmp.lt.s32.totalorder %s1271_s9, %s918_s17  ;;  %p921_p8 = scmp.lt.s32.totalorder %s919_s21, %s912_s28 }
  0x73   : > { %p916_p10 = pneg %p915_p12 }
  0x74   : > { %p922_p6 = por %p921_p8, %p920_p3 }
  0x76   : > { %p923_p1 = pnand %p922_p6, %p916_p10 }
  0x78   : > { %926 = shalt.err (!%p923_p1)
}
  0x79   : > { %718 = dma.hbm_to_vmem [thread:$0]  (!%p1473_p2), %s1276_s1, 16, %s1271_s9, %s1188_s26  }
  0x7a   : > { %p1476_p13 = scmp.ne.s32.totalorder %s1469_s29, 0 }
  0x7b   : > { %p1477_p5 = scmp.eq.s32.totalorder (!%p1476_p13), %s1220_s3, 0 }
  0x7c   : > { %237 = sbr.rel (%p1476_p13) target bundleno = 473 (0x1d9), region = 32 }
  0x83   : > { %1000 = dma.done.wait (%p1477_p5), [#allocation5], 128   ;;  %p1478_p7 = pmov %p1477_p5 }
  0x84   : > { %s243_s7 = sand.u32 1, %s1220_s3   ;;  %s245_s30 = sand.u32 1, %s1029_s16  }
  0x85   : > { %1002 = vsyncadd (%p1478_p7), [#allocation5], 4294967168  ;;  %s630_s11 = sshll.u32 %s245_s30, 6  ;;  %s244_s25 = scalar_lea.sflag [#allocation8], %s243_s7 }
  0x86   : > { %s1334_s23 = scalar_lea.vmem [#allocation7], %s630_s11  ;;  %p1479_p9 = scmp.ne.s32.totalorder %s1466_s5, 0 }
  0x88   : > { %1004 = dma.done.wait (%p1479_p9), %s244_s25, 1040  }
  0x89   : > { %1006 = vsyncadd (%p1479_p9), %s244_s25, 4294966256  ;;  %s279_s1 = sand.u32 1, %s1017_s13   ;;  %p285_p2 = scmp.eq.s32.totalorder %s1037_s18, 0 }
  0x8a   : > { %s1343_s26 = sshll.u32 %s279_s1, 3  ;;  %s1346_s3 = scalar_lea.vmem [#allocation9], %s245_s30  ;;  %v661_v0 = vld [vmem:[#allocation4] sm:$0xff] (%p285_p2)  }
  0x8b   : > { %s281_s29 = scalar_lea.vmem [#allocation10], %s1343_s26  ;;  %290 = sbr.rel (!%p285_p2) target bundleno = 146 (0x92), region = 48  ;;  %v662_v1 = vunpack.c.l.bf16 (%p285_p2), %v661_v0  ;;  %v663_v2 = vunpack.c.h.bf16 (%p285_p2), %v661_v0  ;;  %v822_v3 = vld [vmem:[#allocation4] sm:$0xff] (%p285_p2)  }
  0x8c   : > { %305 = vst [vmem:[#allocation3] sm:$0xff] (%p285_p2), %v822_v3 }
  0x8d   : > { %295 = vst [vmem:[#allocation2] sm:$0xff] (%p285_p2), %v662_v1  ;;  %296 = vst [vmem:[#allocation2 + $0x8] sm:$0xff] (%p285_p2), %v663_v2 }
  0x92 PF: > { %p306_p11 = scmp.gt.s32.totalorder %s1037_s18, 0 }
  0x94   : > { %310 = sbr.rel (!%p306_p11) target bundleno = 155 (0x9b), region = 52  ;;  %v311_v4 = vld [vmem:[#allocation2] sm:$0xff] (%p306_p11)  ;;  %v312_v5 = vld [vmem:[#allocation2 + $0x8] sm:$0xff] (%p306_p11) }
  0x95   : > { %v313_v6 = vpack.c.bf16 (%p306_p11), %v312_v5, %v311_v4 }
  0x97   : > { %314 = vst [vmem:[#allocation3] sm:$0xff] (%p306_p11), %v313_v6 }
  0x9b PF: > { %v823_v7 = vld [vmem:[%s1334_s23] sm:$0xff]   ;;  %v1060_v8 = vmov 0.0   ;;  %v824_v9 = vld [vmem:[%s1334_s23 + $0x8] sm:$0xff]   ;;  %vm1061_vm0 = vmmov 0   ;;  %v825_v10 = vld [vmem:[%s1334_s23 + $0x10] sm:$0xff]   ;;  %p451_p4 = scmp.eq.s32.totalorder %s1037_s18, 1 }
  0x9c   : > { %678 = vmatprep.subr.bf16.mxu0 %v1060_v8  ;;  %694 = vmatprep.mubr.msk.bf16.mxu0 %vm1061_vm0, %v1060_v8  ;;  %v826_v11 = vld [vmem:[%s1334_s23 + $0x18] sm:$0xff]   ;;  %v827_v12 = vld [vmem:[%s1334_s23 + $0x20] sm:$0xff]   ;;  %v828_v13 = vld [vmem:[%s1334_s23 + $0x28] sm:$0xff]  }
  0x9d   : > { %679 = vmatpush3.bf16.msra.mxu0 %v823_v7  ;;  %v829_v14 = vld [vmem:[%s1334_s23 + $0x30] sm:$0xff]   ;;  %v830_v15 = vld [vmem:[%s1334_s23 + $0x38] sm:$0xff]   ;;  %v635_v17 = vld [vmem:[%s1346_s3] ss:$0 sm:$0xff] }
  0x9e   : > { %680 = vmatprep.subr.bf16.mxu0 %v1060_v8  ;;  %v315_v16 = vld [vmem:[#allocation3] sm:$0xff]  ;;  %v445_v31 = vld [vmem:[#allocation2] sm:$0xff]  ;;  %v446_v34 = vld [vmem:[#allocation2 + $0x8] sm:$0xff] }
  0xa1   : > { %681 = vmatpush3.bf16.msra.mxu0 %v824_v9 }
  0xa2   : > { %682 = vmatprep.subr.bf16.mxu0 %v1060_v8 }
  0xa5   : > { %683 = vmatpush3.bf16.msra.mxu0 %v825_v10 }
  0xa6   : > { %684 = vmatprep.subr.bf16.mxu0 %v1060_v8 }
  0xa9   : > { %685 = vmatpush3.bf16.msra.mxu0 %v826_v11 }
  0xaa   : > { %686 = vmatprep.subr.bf16.mxu0 %v1060_v8 }
  0xad   : > { %687 = vmatpush3.bf16.msra.mxu0 %v827_v12 }
  0xae   : > { %688 = vmatprep.subr.bf16.mxu0 %v1060_v8 }
  0xb1   : > { %689 = vmatpush3.bf16.msra.mxu0 %v828_v13 }
  0xb2   : > { %690 = vmatprep.subr.bf16.mxu0 %v1060_v8 }
  0xb5   : > { %691 = vmatpush3.bf16.msra.mxu0 %v829_v14 }
  0xb6   : > { %692 = vmatprep.subr.bf16.mxu0 %v1060_v8 }
  0xb9   : > { %693 = vmatpush3.bf16.msra.mxu0 %v830_v15 }
  0xbc   : > { %695 = vmatmul.mubr.bf16.vlgmr.msra.gmra.mrb[0].mxu0 %v315_v16 }
 0x18f   : > { %v422_v18 = vpop.f32.mrb[0].mxu0 }
 0x190   : > { %v423_v19 = vadd.f32 %v635_v17, %v422_v18  ;;  %v696_v20 = vpop.f32.mrb[1].mxu0 }
 0x191   : > { %v425_v21 = vpop.f32.mrb[2].mxu0 }
 0x192   : > { %v644_v22 = vmul.f32 -1.442695, %v423_v19  ;;  %v426_v23 = vadd.f32 %v635_v17, %v425_v21  ;;  %v697_v24 = vpop.f32.mrb[3].mxu0 }
 0x194   : > { %831 = vpow2.f32 %v644_v22  ;;  %v645_v25 = vmul.f32 -1.442695, %v426_v23 }
 0x196   : > { %833 = vpow2.f32 %v645_v25 }
 0x19e   : > { %v832_v26 = vpop.eup %831 }
 0x19f   : > { %v435_v27 = vadd.f32 1.0, %v832_v26 }
 0x1a0   : > { %v834_v28 = vpop.eup %833 }
 0x1a1   : > { %835 = vrcp.f32 %v435_v27  ;;  %v436_v29 = vadd.f32 1.0, %v834_v28 }
 0x1a3   : > { %837 = vrcp.f32 %v436_v29 }
 0x1ab   : > { %v836_v30 = vpop.eup %835 }
 0x1ac   : > { %v441_v32 = vmul.f32 %v836_v30, %v423_v19  ;;  %455 = sbr.rel (!%p451_p4) target bundleno = 445 (0x1bd), region = 56 }
 0x1ad   : > { %v838_v33 = vpop.eup %837 }
 0x1ae   : > { %v447_v35 = vadd.f32 %v445_v31, %v441_v32  ;;  %v442_v36 = vmul.f32 %v838_v33, %v426_v23 }
 0x1b0   : > { %449 = vst [vmem:[#allocation2] sm:$0xff] %v447_v35  ;;  %v448_v37 = vadd.f32 %v446_v34, %v442_v36 }
 0x1b2   : > { %450 = vst [vmem:[#allocation2 + $0x8] sm:$0xff] %v448_v37 }
 0x1b7   : > { %v456_v38 = vld [vmem:[#allocation2] sm:$0xff] }
 0x1b9   : > { %v457_v39 = vld [vmem:[#allocation2 + $0x8] sm:$0xff] }
 0x1ba   : > { %v667_v40 = vpack.c.bf16 %v457_v39, %v456_v38 }
 0x1bc   : > { %668 = vst [vmem:[%s281_s29] sm:$0xff] %v667_v40  }
 0x1bd PF: > { %s1480_s5 = sld [smem:[#allocation15_spill]]  ;;  %s1481_s6 = sld [smem:[#allocation21_spill]] }
 0x1be   : > { %s484_s18 = sshll.u32 %s281_s29, 4  ;;  %s1376_s28 = scalar_lea.sflag [#allocation6], %s279_s1  ;;  %s1372_s18 = int_to_ptr.vmem [resolvable:$true] %s484_s18 }
 0x1bf   : > { %s927_s10 = scalar_lea.vmem %s1372_s18, 128  ;;  %p1482_p12 = scmp.ne.s32.totalorder %s1467_s15, 0 }
 0x1c0   : > { %p928_p0 = scmp.ne.s32.totalorder %s1372_s18, %s927_s10  ;;  %s1062_s17 = smov [#allocation10]  }
 0x1c1   : > { %s931_s21 = sshll.u32 %s1062_s17, 4  ;;  %s932_s21 = int_to_ptr.vmem [resolvable:$false] %s931_s21 }
 0x1c2   : > { %p929_p10 = pnand %p928_p0, %p1482_p12  ;;  %s933_s7 = scalar_lea.vmem %s932_s21, 256 }
 0x1c3   : > { %s659_s9 = sshll.u32 %s1480_s5, 7  ;;  %p934_p8 = scmp.lt.s32.totalorder %s1372_s18, %s932_s21 }
 0x1c4   : > { %s1368_s24 = scalar_lea.hbm %s1481_s6, %s659_s9  ;;  %p930_p3 = pneg %p929_p10 }
 0x1c5   : > { %p935_p6 = scmp.lt.s32.totalorder %s933_s7, %s927_s10 }
 0x1c7   : > { %p936_p1 = por %p935_p6, %p934_p8 }
 0x1c9   : > { %p937_p13 = pnand %p936_p1, %p930_p3 }
 0x1cb   : > { %940 = shalt.err (!%p937_p13)
}
 0x1cc   : > { %s941_s30 = scalar_lea.hbm %s1368_s24, 128  ;;  %s945_s23 = scalar_lea.hbm %s1481_s6, 512 }
 0x1cd   : > { %p942_p5 = scmp.ne.s32.totalorder %s1368_s24, %s941_s30  ;;  %p946_p2 = scmp.lt.u32.totalorder %s1368_s24, %s1481_s6 }
 0x1ce   : > { %p947_p11 = scmp.lt.u32.totalorder %s945_s23, %s941_s30  ;;  %p949_p0 = scmp.lt.u32.totalorder %s941_s30, %s1368_s24 }
 0x1cf   : > { %p943_p7 = pnand %p942_p5, %p1482_p12 }
 0x1d0   : > { %p948_p4 = por %p947_p11, %p946_p2 }
 0x1d1   : > { %p944_p9 = pneg %p943_p7 }
 0x1d2   : > { %p950_p10 = por %p949_p0, %p948_p4 }
 0x1d4   : > { %p951_p3 = pnand %p950_p10, %p944_p9 }
 0x1d6   : > { %954 = shalt.err (!%p951_p3)
}
 0x1d7   : > { %s1063_s3 = smov 64   ;;  %s1064_s29 = smov 4  }
 0x1d8   : > { %706 = dma.vmem_to_hbm [thread:$0]  (%p1482_p12), %s1372_s18, 128, %s1368_s24, %s1376_s28, %s1063_s3, %s1063_s3, %s1064_s29  }
 0x1d9 PF: > { %p726_p8 = scmp.ge.s32.totalorder %s1053_s22, 2  ;;  %s499_s5 = sand.u32 1, %s1013_s12  }
 0x1da   : > { %p1483_p6 = scmp.ne.s32.totalorder %s1468_s19, 0  ;;  %s500_s9 = scalar_lea.sflag [#allocation6], %s499_s5 }
 0x1dc   : > { %p720_p1 = pnand %p726_p8, %p1483_p6 }
 0x1de   : > { %1008 = dma.done.wait (!%p720_p1), %s500_s9, 128  }
 0x1df   : > { %1010 = vsyncadd (!%p720_p1), %s500_s9, 4294967168  ;;  %s20_s22 = sadd.s32 1, %s1053_s22   ;;  %s1484_s4 = sld [smem:[#allocation14_spill]] }
 0x1e0   : > { %p17_p13 = scmp.ge.s32.totalorder %s20_s22, 10   ;;  %s1485_s17 = sld [smem:[#allocation19_spill]] }
 0x1e1   : > { %s1486_s19 = sld [smem:[#allocation16_spill]]  ;;  %s1487_s8 = sld [smem:[#allocation17_spill]] }
 0x1e2   : > { %s1488_s21 = sld [smem:[#allocation18_spill]]  ;;  %s1489_s12 = smov %s1017_s13 }
 0x1e3   : > { %s1490_s13 = smov %s1021_s14  ;;  %s1491_s14 = smov %s1230_s27 }
 0x1e4   : > { %s1492_s15 = smov %s1029_s16  ;;  %s1494_s18 = smov %s1045_s20 }
 0x1e5   : > { %s1493_s16 = smov %s1484_s4  ;;  %19 = sbr.rel (!%p17_p13) target bundleno = 13 (0xd), region = 108 }
 0x1e7   : > { %s1495_s20 = smov %s1487_s8 }
 0x1ec   :  { %505 = vsyncpa [#allocation5], 1 }
 0x1ed   :  { %507 = vsyncpa [#allocation5 + $0x1], 1 }
 0x1ee   :  { %508 = vsyncpa [#allocation8], 1 }
 0x1ef   :  { %510 = vsyncpa [#allocation8 + $0x1], 1 }
 0x1f0   :  { %511 = vsyncpa [#allocation6], 1 }
 0x1f1   :  { %513 = vsyncpa [#allocation6 + $0x1], 1 }

</bundles_post_ra>
